<compile_context>
chip_gen: v7x
topology: tpu7x:2x2x1
jax: 0.10.0
libtpu: 0.0.40
codegen_flags: <defaults>
</compile_context>

<pallas_src>
import functools

import jax
import jax.numpy as jnp
from jax.experimental import pallas as pl
from jax.experimental.pallas import tpu as pltpu

IN_FEATURES = 28 * 28   # 784
H1 = 128                # layer-1 width (already lane-aligned)
H2 = 64                 # layer-2 true width
OUT = 10                # logits
H2_PAD = 128            # layer-2 padded width (lane-dense)
OUT_PAD = 128           # logits padded width (lane-dense, unmasked stores)


def _round_up(x, m):
    return ((x + m - 1) // m) * m


def mlp_kernel(x_ref, w1_ref, b1_ref, w2_ref, b2_ref, w3_ref, b3_ref, o_ref):
    # One batch tile per grid step; all weights stay resident in VMEM.
    x = x_ref[...]                                                     # (TILE_B, 784) bf16
    h1 = jnp.dot(x, w1_ref[...], preferred_element_type=jnp.float32) + b1_ref[...]
    h1 = jnp.maximum(h1, 0.0).astype(jnp.bfloat16)                     # ReLU
    # Dropout(0.2): identity in eval mode.
    h2 = jnp.dot(h1, w2_ref[...], preferred_element_type=jnp.float32) + b2_ref[...]
    h2 = jnp.maximum(h2, 0.0).astype(jnp.bfloat16)                     # ReLU (padded cols stay 0)
    out = jnp.dot(h2, w3_ref[...], preferred_element_type=jnp.float32) + b3_ref[...]
    o_ref[...] = out.astype(o_ref.dtype)                               # (TILE_B, 128) f32


@functools.partial(jax.jit, static_argnames=("tile_b",))
def simple_nn_forward(x_nchw, params, *, tile_b=1024):
    """x_nchw: (B, 1, 28, 28) float32. Returns logits (B, 10) float32."""
    w1, b1, w2, b2, w3, b3 = params
    B = x_nchw.shape[0]
    x2d = x_nchw.reshape(B, IN_FEATURES)                               # nn.Flatten (NCHW, C=1)

    # Batch tiling: TILE_B rows per grid step, pad B up to a multiple of TILE_B.
    TILE_B = min(tile_b, _round_up(B, 8))
    B_pad = _round_up(B, TILE_B)
    if B_pad != B:
        x2d = jnp.pad(x2d, ((0, B_pad - B), (0, 0)))

    # Pad layers 2/3 to 128 output lanes (zeros are exact: ReLU(0)=0, zero rows/cols
    # of w3 contribute nothing, and the padded logit columns are sliced off below).
    w2p = jnp.zeros((H1, H2_PAD), jnp.float32).at[:, :H2].set(w2)
    b2p = jnp.zeros((1, H2_PAD), jnp.float32).at[:, :H2].set(b2)
    w3p = jnp.zeros((H2_PAD, OUT_PAD), jnp.float32).at[:H2, :OUT].set(w3)
    b3p = jnp.zeros((1, OUT_PAD), jnp.float32).at[:, :OUT].set(b3)

    # bf16 activations/weights; biases and accumulation stay f32.
    xb = x2d.astype(jnp.bfloat16)
    w1b = w1.astype(jnp.bfloat16)
    w2b = w2p.astype(jnp.bfloat16)
    w3b = w3p.astype(jnp.bfloat16)

    grid = (B_pad // TILE_B,)

    flops = 2 * B_pad * (IN_FEATURES * H1 + H1 * H2_PAD + H2_PAD * OUT_PAD)
    bytes_accessed = (
        B_pad * IN_FEATURES * 2                                        # x (bf16)
        + (IN_FEATURES * H1 + H1 * H2_PAD + H2_PAD * OUT_PAD) * 2      # weights (bf16)
        + (H1 + H2_PAD + OUT_PAD) * 4                                  # biases (f32)
        + B_pad * OUT_PAD * 4                                          # logits out (f32)
    )

    out_padded = pl.pallas_call(
        mlp_kernel,
        out_shape=jax.ShapeDtypeStruct((B_pad, OUT_PAD), jnp.float32),
        grid=grid,
        in_specs=[
            pl.BlockSpec((TILE_B, IN_FEATURES), lambda i: (i, 0)),     # x tile: pipelined
            pl.BlockSpec((IN_FEATURES, H1), lambda i: (0, 0)),         # weights: VMEM-resident
            pl.BlockSpec((1, H1), lambda i: (0, 0)),
            pl.BlockSpec((H1, H2_PAD), lambda i: (0, 0)),
            pl.BlockSpec((1, H2_PAD), lambda i: (0, 0)),
            pl.BlockSpec((H2_PAD, OUT_PAD), lambda i: (0, 0)),
            pl.BlockSpec((1, OUT_PAD), lambda i: (0, 0)),
        ],
        out_specs=pl.BlockSpec((TILE_B, OUT_PAD), lambda i: (i, 0)),
        compiler_params=pltpu.CompilerParams(
            dimension_semantics=("parallel",),                         # shard batch across TCs (v7x)
        ),
        cost_estimate=pl.CostEstimate(
            flops=flops, transcendentals=0, bytes_accessed=bytes_accessed
        ),
    )(xb, w1b, b1, w2b, b2p, w3b, b3p)

    return out_padded[:B, :OUT]


def init_params(key):
    """Deterministic init mimicking torch.nn.Linear default (U[-1/sqrt(fan_in), 1/sqrt(fan_in)])."""
    def linear(key, fan_in, fan_out):
        kw, kb = jax.random.split(key)
        bound = 1.0 / jnp.sqrt(fan_in)
        w = jax.random.uniform(kw, (fan_in, fan_out), jnp.float32, -bound, bound)
        b = jax.random.uniform(kb, (1, fan_out), jnp.float32, -bound, bound)
        return w, b

    k1, k2, k3 = jax.random.split(key, 3)
    w1, b1 = linear(k1, IN_FEATURES, H1)
    w2, b2 = linear(k2, H1, H2)
    w3, b3 = linear(k3, H2, OUT)
    return (w1, b1, w2, b2, w3, b3)


if __name__ == "__main__":
    key = jax.random.PRNGKey(0)
    k_params, k_x = jax.random.split(key)

    params = init_params(k_params)
    x = jax.random.normal(k_x, (2, 1, 28, 28), jnp.float32)  # (B, C, H, W)

    logits = simple_nn_forward(x, params)
    jax.block_until_ready(logits)

    # Cross-check against a pure-JAX f32 reference of the same forward pass.
    # Tolerance loosened to account for the bf16 activation/weight cast in the kernel.
    w1, b1, w2, b2, w3, b3 = params
    x2d = x.reshape(x.shape[0], -1)
    ref = jnp.maximum(x2d @ w1 + b1, 0.0)
    ref = jnp.maximum(ref @ w2 + b2, 0.0)
    ref = ref @ w3 + b3

    assert logits.shape == (2, 10)
    assert jnp.allclose(logits, ref, atol=2e-2, rtol=2e-2), (
        f"max abs err {jnp.max(jnp.abs(logits - ref))}"
    )

    print("KERNEL_OK")
</pallas_src>

<mosaic_0001>
module attributes {stable_mosaic.version = 11 : i64} {
  func.func @mlp_kernel(%arg0: i32, %arg1: memref<8x784xbf16, #tpu.memory_space<vmem>>, %arg2: memref<784x128xbf16, #tpu.memory_space<vmem>>, %arg3: memref<1x128xf32, #tpu.memory_space<vmem>>, %arg4: memref<128x128xbf16, #tpu.memory_space<vmem>>, %arg5: memref<1x128xf32, #tpu.memory_space<vmem>>, %arg6: memref<128x128xbf16, #tpu.memory_space<vmem>>, %arg7: memref<1x128xf32, #tpu.memory_space<vmem>>, %arg8: memref<8x128xf32, #tpu.memory_space<vmem>>) attributes {dimension_semantics = [#tpu.dimension_semantics<parallel>], iteration_bounds = array<i64: 1>, scalar_prefetch = 0 : i64, scratch_operands = 0 : i64, tpu.core_type = #tpu.core_type<tc>, window_params = [{transform_indices = @transform_0, window_bounds = array<i64: 8, 784>}, {pipeline_mode = #tpu.pipeline_mode<synchronous>, transform_indices = @transform_1, window_bounds = array<i64: 784, 128>}, {pipeline_mode = #tpu.pipeline_mode<synchronous>, transform_indices = @transform_2, window_bounds = array<i64: 1, 128>}, {pipeline_mode = #tpu.pipeline_mode<synchronous>, transform_indices = @transform_3, window_bounds = array<i64: 128, 128>}, {pipeline_mode = #tpu.pipeline_mode<synchronous>, transform_indices = @transform_4, window_bounds = array<i64: 1, 128>}, {pipeline_mode = #tpu.pipeline_mode<synchronous>, transform_indices = @transform_5, window_bounds = array<i64: 128, 128>}, {pipeline_mode = #tpu.pipeline_mode<synchronous>, transform_indices = @transform_6, window_bounds = array<i64: 1, 128>}, {transform_indices = @transform_7, window_bounds = array<i64: 8, 128>}]} {
    %c0 = arith.constant 0 : index
    %c0_0 = arith.constant 0 : index
    %0 = vector.load %arg1[%c0, %c0_0] : memref<8x784xbf16, #tpu.memory_space<vmem>>, vector<8x784xbf16>
    %c0_1 = arith.constant 0 : index
    %c0_2 = arith.constant 0 : index
    %1 = vector.load %arg2[%c0_1, %c0_2] : memref<784x128xbf16, #tpu.memory_space<vmem>>, vector<784x128xbf16>
    %cst = arith.constant dense<0.000000e+00> : vector<8x128xf32>
    %2 = tpu.matmul %0, %1, %cst {dimension_numbers = #tpu.dot_dimension_numbers<[1], [0], [0], [1], [0, 0, 1, 1], [], []>} : vector<8x784xbf16>, vector<784x128xbf16>, vector<8x128xf32> -> vector<8x128xf32>
    %c0_3 = arith.constant 0 : index
    %c0_4 = arith.constant 0 : index
    %3 = vector.load %arg3[%c0_3, %c0_4] : memref<1x128xf32, #tpu.memory_space<vmem>>, vector<1x128xf32>
    %4 = vector.broadcast %3 : vector<1x128xf32> to vector<8x128xf32>
    %5 = arith.addf %2, %4 : vector<8x128xf32>
    %cst_5 = arith.constant 0.000000e+00 : f32
    %6 = vector.broadcast %cst_5 : f32 to vector<8x128xf32>
    %7 = arith.maximumf %5, %6 : vector<8x128xf32>
    %8 = arith.truncf %7 : vector<8x128xf32> to vector<8x128xbf16>
    %c0_6 = arith.constant 0 : index
    %c0_7 = arith.constant 0 : index
    %9 = vector.load %arg4[%c0_6, %c0_7] : memref<128x128xbf16, #tpu.memory_space<vmem>>, vector<128x128xbf16>
    %cst_8 = arith.constant dense<0.000000e+00> : vector<8x128xf32>
    %10 = tpu.matmul %8, %9, %cst_8 {dimension_numbers = #tpu.dot_dimension_numbers<[1], [0], [0], [1], [0, 0, 1, 1], [], []>} : vector<8x128xbf16>, vector<128x128xbf16>, vector<8x128xf32> -> vector<8x128xf32>
    %c0_9 = arith.constant 0 : index
    %c0_10 = arith.constant 0 : index
    %11 = vector.load %arg5[%c0_9, %c0_10] : memref<1x128xf32, #tpu.memory_space<vmem>>, vector<1x128xf32>
    %12 = vector.broadcast %11 : vector<1x128xf32> to vector<8x128xf32>
    %13 = arith.addf %10, %12 : vector<8x128xf32>
    %cst_11 = arith.constant 0.000000e+00 : f32
    %14 = vector.broadcast %cst_11 : f32 to vector<8x128xf32>
    %15 = arith.maximumf %13, %14 : vector<8x128xf32>
    %16 = arith.truncf %15 : vector<8x128xf32> to vector<8x128xbf16>
    %c0_12 = arith.constant 0 : index
    %c0_13 = arith.constant 0 : index
    %17 = vector.load %arg6[%c0_12, %c0_13] : memref<128x128xbf16, #tpu.memory_space<vmem>>, vector<128x128xbf16>
    %cst_14 = arith.constant dense<0.000000e+00> : vector<8x128xf32>
    %18 = tpu.matmul %16, %17, %cst_14 {dimension_numbers = #tpu.dot_dimension_numbers<[1], [0], [0], [1], [0, 0, 1, 1], [], []>} : vector<8x128xbf16>, vector<128x128xbf16>, vector<8x128xf32> -> vector<8x128xf32>
    %c0_15 = arith.constant 0 : index
    %c0_16 = arith.constant 0 : index
    %19 = vector.load %arg7[%c0_15, %c0_16] : memref<1x128xf32, #tpu.memory_space<vmem>>, vector<1x128xf32>
    %20 = vector.broadcast %19 : vector<1x128xf32> to vector<8x128xf32>
    %21 = arith.addf %18, %20 : vector<8x128xf32>
    %c0_17 = arith.constant 0 : index
    %c0_18 = arith.constant 0 : index
    %22 = vector.load %arg8[%c0_17, %c0_18] : memref<8x128xf32, #tpu.memory_space<vmem>>, vector<8x128xf32>
    tpu.vector_store %arg8[%c0_17, %c0_18], %21 {strides = array<i32>} : memref<8x128xf32, #tpu.memory_space<vmem>>, vector<8x128xf32>,
    return
  }
  func.func @transform_0(%arg0: i32) -> (i32, i32) {
    %c0_i32 = arith.constant 0 : i32
    %c0_i32_0 = arith.constant 0 : i32
    return %arg0, %c0_i32 : i32, i32
  }
  func.func @transform_1(%arg0: i32) -> (i32, i32) {
    %c0_i32 = arith.constant 0 : i32
    %c0_i32_0 = arith.constant 0 : i32
    %c0_i32_1 = arith.constant 0 : i32
    return %c0_i32, %c0_i32_0 : i32, i32
  }
  func.func @transform_2(%arg0: i32) -> (i32, i32) {
    %c0_i32 = arith.constant 0 : i32
    %c0_i32_0 = arith.constant 0 : i32
    %c0_i32_1 = arith.constant 0 : i32
    return %c0_i32, %c0_i32_0 : i32, i32
  }
  func.func @transform_3(%arg0: i32) -> (i32, i32) {
    %c0_i32 = arith.constant 0 : i32
    %c0_i32_0 = arith.constant 0 : i32
    %c0_i32_1 = arith.constant 0 : i32
    return %c0_i32, %c0_i32_0 : i32, i32
  }
  func.func @transform_4(%arg0: i32) -> (i32, i32) {
    %c0_i32 = arith.constant 0 : i32
    %c0_i32_0 = arith.constant 0 : i32
    %c0_i32_1 = arith.constant 0 : i32
    return %c0_i32, %c0_i32_0 : i32, i32
  }
  func.func @transform_5(%arg0: i32) -> (i32, i32) {
    %c0_i32 = arith.constant 0 : i32
    %c0_i32_0 = arith.constant 0 : i32
    %c0_i32_1 = arith.constant 0 : i32
    return %c0_i32, %c0_i32_0 : i32, i32
  }
  func.func @transform_6(%arg0: i32) -> (i32, i32) {
    %c0_i32 = arith.constant 0 : i32
    %c0_i32_0 = arith.constant 0 : i32
    %c0_i32_1 = arith.constant 0 : i32
    return %c0_i32, %c0_i32_0 : i32, i32
  }
  func.func @transform_7(%arg0: i32) -> (i32, i32) {
    %c0_i32 = arith.constant 0 : i32
    %c0_i32_0 = arith.constant 0 : i32
    return %arg0, %c0_i32 : i32, i32
  }
}

</mosaic_0001>

<bundles_post_ra>
// kernel: simple_nn_forward.1
= control target key start
LH: loop header
LB: loop body
LE: loop exit
PB: predicated region body
PF: predicated region fallthrough
CT: control target
= control target key end

     0   :  { %v1131_v41 = vmov 0.0   ;;  %vm1132_vm0 = vmmov 0   ;;  %vm454_vm1 = vcmask 130048   ;;  %s1415_s1 = inlined_call_operand.vmem [shape: bf16[784,128], index: 1, kind: input, shape index: {}]   ;;  %s1416_s0 = inlined_call_operand.vmem [shape: bf16[8,784], index: 0, kind: input, shape index: {}]   ;;  %s1417_s3 = inlined_call_operand.vmem [shape: bf16[128,128], index: 3, kind: input, shape index: {}]   ;;  %s1418_s5 = inlined_call_operand.vmem [shape: bf16[128,128], index: 5, kind: input, shape index: {}]   ;;  %s1419_s2 = inlined_call_operand.vmem [shape: f32[1,128], index: 2, kind: input, shape index: {}]   ;;  %s1420_s4 = inlined_call_operand.vmem [shape: f32[1,128], index: 4, kind: input, shape index: {}]   ;;  %s1421_s6 = inlined_call_operand.vmem [shape: f32[1,128], index: 6, kind: input, shape index: {}]   ;;  %s1422_s7 = inlined_call_operand.vmem [shape: f32[8,128], index: 7, kind: output, shape index: {}]  }
   0x1   :  { %v1059_v0 = vld [vmem:[%s1415_s1 + $0x40] sm:$0xff]   ;;  %v1063_v4 = vld [vmem:[%s1415_s1 + $0x48] sm:$0xff]   ;;  %v1067_v8 = vld [vmem:[%s1415_s1 + $0x50] sm:$0xff]  }
   0x2   :  { %v1060_v1 = vld [vmem:[%s1415_s1] sm:$0xff]   ;;  %925 = vmatprep.subr.bf16.mxu0 %v1059_v0  ;;  %v1064_v5 = vld [vmem:[%s1415_s1 + $0x8] sm:$0xff]   ;;  %v1068_v9 = vld [vmem:[%s1415_s1 + $0x10] sm:$0xff]  }
   0x3   :  { %v1061_v2 = vld [vmem:[%s1415_s1 + $0xc0] sm:$0xff]   ;;  %926 = vmatpush3.bf16.msra.mxu0 %v1060_v1  ;;  %v1065_v6 = vld [vmem:[%s1415_s1 + $0xc8] sm:$0xff]   ;;  %v1069_v10 = vld [vmem:[%s1415_s1 + $0xd0] sm:$0xff]  }
   0x4   :  { %v1062_v3 = vld [vmem:[%s1415_s1 + $0x80] sm:$0xff]   ;;  %947 = vmatprep.subr.bf16.mxu1 %v1061_v2  ;;  %927 = vmatprep.subr.bf16.mxu0 %v1063_v4  ;;  %v1066_v7 = vld [vmem:[%s1415_s1 + $0x88] sm:$0xff]   ;;  %v1070_v11 = vld [vmem:[%s1415_s1 + $0x90] sm:$0xff]  }
   0x5   :  { %948 = vmatpush3.bf16.msra.mxu1 %v1062_v3  ;;  %v1071_v12 = vld [vmem:[%s1415_s1 + $0x58] sm:$0xff]   ;;  %v1075_v16 = vld [vmem:[%s1415_s1 + $0x60] sm:$0xff]   ;;  %v1079_v20 = vld [vmem:[%s1415_s1 + $0x68] sm:$0xff]  }
   0x6   :  { %949 = vmatprep.subr.bf16.mxu1 %v1065_v6  ;;  %v1072_v13 = vld [vmem:[%s1415_s1 + $0x18] sm:$0xff]   ;;  %v1076_v17 = vld [vmem:[%s1415_s1 + $0x20] sm:$0xff]   ;;  %v1080_v21 = vld [vmem:[%s1415_s1 + $0x28] sm:$0xff]  }
   0x7   :  { %928 = vmatpush3.bf16.msra.mxu0 %v1064_v5  ;;  %v1073_v14 = vld [vmem:[%s1415_s1 + $0xd8] sm:$0xff]   ;;  %v1077_v18 = vld [vmem:[%s1415_s1 + $0xe0] sm:$0xff]   ;;  %v1081_v22 = vld [vmem:[%s1415_s1 + $0xe8] sm:$0xff]  }
   0x8   :  { %929 = vmatprep.subr.bf16.mxu0 %v1067_v8  ;;  %v1074_v15 = vld [vmem:[%s1415_s1 + $0x98] sm:$0xff]   ;;  %v1078_v19 = vld [vmem:[%s1415_s1 + $0xa0] sm:$0xff]   ;;  %v1082_v23 = vld [vmem:[%s1415_s1 + $0xa8] sm:$0xff]  }
   0x9   :  { %950 = vmatpush3.bf16.msra.mxu1 %v1066_v7  ;;  %v1083_v24 = vld [vmem:[%s1415_s1 + $0x70] sm:$0xff]   ;;  %v1087_v28 = vld [vmem:[%s1415_s1 + $0x78] sm:$0xff]   ;;  %v27_v31 = vld [vmem:[%s1416_s0] sm:$0xff] }
   0xa   :  { %951 = vmatprep.subr.bf16.mxu1 %v1069_v10  ;;  %v1084_v25 = vld [vmem:[%s1415_s1 + $0x30] sm:$0xff]   ;;  %v1088_v29 = vld [vmem:[%s1415_s1 + $0x38] sm:$0xff]   ;;  %v850_v32 = vcombine.low %v27_v31, %v27_v31  ;;  %v851_v33 = vcombine.high %v27_v31, %v27_v31  ;;  %v1094_v35 = vld [vmem:[%s1415_s1 + $0x140] sm:$0xff]  }
   0xb   :  { %930 = vmatpush3.bf16.msra.mxu0 %v1068_v9  ;;  %v1085_v26 = vld [vmem:[%s1415_s1 + $0xf0] sm:$0xff]   ;;  %v1089_v30 = vld [vmem:[%s1415_s1 + $0xf8] sm:$0xff]   ;;  %v28_v36 = vld [vmem:[%s1416_s0 + $0x8] sm:$0xff] }
   0xc   :  { %931 = vmatprep.subr.bf16.mxu0 %v1071_v12  ;;  %v1086_v27 = vld [vmem:[%s1415_s1 + $0xb0] sm:$0xff]   ;;  %v1093_v34 = vld [vmem:[%s1415_s1 + $0xb8] sm:$0xff]   ;;  %490 = vmatprep.mubr.bf16.mxu0 %v851_v33  ;;  %v852_v37 = vcombine.low %v28_v36, %v28_v36  ;;  %v853_v38 = vcombine.high %v28_v36, %v28_v36  ;;  %v1097_v39 = vld [vmem:[%s1415_s1 + $0x100] sm:$0xff]  }
   0xd   :  { %952 = vmatpush3.bf16.msra.mxu1 %v1070_v11  ;;  %v1098_v40 = vld [vmem:[%s1415_s1 + $0x148] sm:$0xff]   ;;  %v1100_v43 = vld [vmem:[%s1415_s1 + $0x150] sm:$0xff]   ;;  %v1102_v45 = vld [vmem:[%s1415_s1 + $0x158] sm:$0xff]  }
   0xe   :  { %953 = vmatprep.subr.bf16.mxu1 %v1073_v14  ;;  %530 = vmatprep.mubr.bf16.mxu1 %v853_v38  ;;  %v1099_v42 = vld [vmem:[%s1415_s1 + $0x108] sm:$0xff]   ;;  %v1101_v44 = vld [vmem:[%s1415_s1 + $0x110] sm:$0xff]   ;;  %v1103_v46 = vld [vmem:[%s1415_s1 + $0x118] sm:$0xff]  }
   0xf   :  { %932 = vmatpush3.bf16.msra.mxu0 %v1072_v13  ;;  %v1104_v47 = vld [vmem:[%s1415_s1 + $0x160] sm:$0xff]   ;;  %v1106_v49 = vld [vmem:[%s1415_s1 + $0x168] sm:$0xff]   ;;  %v29_v51 = vld [vmem:[%s1416_s0 + $0x10] sm:$0xff] }
  0x10   :  { %933 = vmatprep.subr.bf16.mxu0 %v1075_v16  ;;  %v1105_v48 = vld [vmem:[%s1415_s1 + $0x120] sm:$0xff]   ;;  %v1092_v52 = vld [vmem:[%s1416_s0 + $0x18] ss:$0 sps:$4 sm:$0xff]   ;;  %v855_v53 = vcombine.high %v29_v51, %v29_v51  ;;  %v1107_v54 = vld [vmem:[%s1415_s1 + $0x128] sm:$0xff]   ;;  %v854_v59 = vcombine.low %v29_v51, %v29_v51 }
  0x11   :  { %954 = vmatpush3.bf16.msra.mxu1 %v1074_v15  ;;  %v1112_v50 = vld [vmem:[%s1415_s1 + $0x180] sm:$0xff]   ;;  %v1108_v55 = vld [vmem:[%s1415_s1 + $0x170] sm:$0xff]   ;;  %v1110_v57 = vld [vmem:[%s1415_s1 + $0x178] sm:$0xff]  }
  0x12   :  { %955 = vmatprep.subr.bf16.mxu1 %v1077_v18  ;;  %v1109_v56 = vld [vmem:[%s1415_s1 + $0x130] sm:$0xff]   ;;  %v1111_v58 = vld [vmem:[%s1415_s1 + $0x138] sm:$0xff]   ;;  %v1115_v60 = vld [vmem:[%s1417_s3] sm:$0xff]  }
  0x13   :  { %934 = vmatpush3.bf16.msra.mxu0 %v1076_v17  ;;  %v1116_v61 = vld [vmem:[%s1417_s3 + $0x8] sm:$0xff]   ;;  %v1117_v62 = vld [vmem:[%s1417_s3 + $0x10] sm:$0xff]   ;;  %v1118_v63 = vld [vmem:[%s1417_s3 + $0x18] sm:$0xff]  }
  0x14   :  { %935 = vmatprep.subr.bf16.mxu0 %v1079_v20  ;;  %v1119_v0 = vld [vmem:[%s1417_s3 + $0x20] sm:$0xff]   ;;  %v1120_v1 = vld [vmem:[%s1417_s3 + $0x28] sm:$0xff]   ;;  %v1121_v2 = vld [vmem:[%s1417_s3 + $0x30] sm:$0xff]  }
  0x15   :  { %956 = vmatpush3.bf16.msra.mxu1 %v1078_v19  ;;  %v1122_v3 = vld [vmem:[%s1417_s3 + $0x38] sm:$0xff]   ;;  %v1123_v4 = vld [vmem:[%s1418_s5] sm:$0xff]   ;;  %v1124_v5 = vld [vmem:[%s1418_s5 + $0x8] sm:$0xff]  }
  0x16   :  { %957 = vmatprep.subr.bf16.mxu1 %v1081_v22  ;;  %v1125_v6 = vld [vmem:[%s1418_s5 + $0x10] sm:$0xff]   ;;  %v1126_v7 = vld [vmem:[%s1418_s5 + $0x18] sm:$0xff]   ;;  %v1127_v8 = vld [vmem:[%s1418_s5 + $0x20] sm:$0xff]  }
  0x17   :  { %936 = vmatpush3.bf16.msra.mxu0 %v1080_v21  ;;  %v1128_v9 = vld [vmem:[%s1418_s5 + $0x28] sm:$0xff]   ;;  %v849_v11 = vld [vmem:[%s1419_s2] ss:$0 sm:$0xff]  ;;  %v1129_v36 = vld [vmem:[%s1418_s5 + $0x30] sm:$0xff]  }
  0x18   :  { %937 = vmatprep.subr.bf16.mxu0 %v1083_v24  ;;  %v907_v38 = vld [vmem:[%s1420_s4] ss:$0 sm:$0xff] }
  0x19   :  { %958 = vmatpush3.bf16.msra.mxu1 %v1082_v23 }
  0x1a   :  { %959 = vmatprep.subr.bf16.mxu1 %v1085_v26 }
  0x1b   :  { %938 = vmatpush3.bf16.msra.mxu0 %v1084_v25 }
  0x1c   :  { %939 = vmatprep.subr.bf16.mxu0 %v1087_v28 }
  0x1d   :  { %960 = vmatpush3.bf16.msra.mxu1 %v1086_v27 }
  0x1e   :  { %961 = vmatprep.subr.bf16.mxu1 %v1089_v30 }
  0x1f   :  { %940 = vmatpush3.bf16.msra.mxu0 %v1088_v29 }
  0x20   :  { %969 = vmatprep.subr.bf16.mxu0 %v1094_v35 }
  0x21   :  { %962 = vmatpush3.bf16.msra.mxu1 %v1093_v34 }
  0x22   :  { %491 = vmatmul.mubr.bf16.vlgmr.msra.gmra.mrb[0].mxu0 %v850_v32  ;;  %1011 = vmatprep.subr.bf16.mxu1 %v1131_v41 }
  0x23   :  { %970 = vmatpush3.bf16.msra.mxu0 %v1097_v39  ;;  %570 = vmatprep.mubr.bf16.mxu0 %v855_v53 }
  0x24   :  { %531 = vmatmul.mubr.bf16.vlgmr.msra.gmra.mrb[0].mxu1 %v852_v37  ;;  %971 = vmatprep.subr.bf16.mxu0 %v1098_v40  ;;  %v1130_v37 = vld [vmem:[%s1418_s5 + $0x38] sm:$0xff]  }
  0x25   :  { %1013 = vmatprep.mubr.msk.bf16.mxu1 %vm1132_vm0, %v1131_v41  ;;  %1012 = vmatpush3.bf16.msra.mxu1 %v1112_v50 }
  0x26   :  { %1017 = vmatprep.subr.bf16.mxu1 %v1131_v41 }
  0x27   :  { %972 = vmatpush3.bf16.msra.mxu0 %v1099_v42 }
  0x28   :  { %973 = vmatprep.subr.bf16.mxu0 %v1100_v43 }
  0x2b   :  { %974 = vmatpush3.bf16.msra.mxu0 %v1101_v44 }
  0x2c   :  { %975 = vmatprep.subr.bf16.mxu0 %v1102_v45  ;;  %1014 = vmatmul.mubr.msk.bf16.vlgmr.msra.gmra.mrb[4].mxu1 %vm454_vm1, %v1092_v52 }
  0x2d   :  { %1033 = vmatprep.mubr.msk.bf16.mxu1 %vm1132_vm0, %v1131_v41  ;;  %1018 = vmatpush3.bf16.msra.mxu1 %v1115_v60 }
  0x2e   :  { %1019 = vmatprep.subr.bf16.mxu1 %v1131_v41 }
  0x2f   :  { %976 = vmatpush3.bf16.msra.mxu0 %v1103_v46 }
  0x30   :  { %977 = vmatprep.subr.bf16.mxu0 %v1104_v47 }
  0x31   :  { %1020 = vmatpush3.bf16.msra.mxu1 %v1116_v61 }
  0x32   :  { %1021 = vmatprep.subr.bf16.mxu1 %v1131_v41 }
  0x33   :  { %978 = vmatpush3.bf16.msra.mxu0 %v1105_v48 }
  0x34   :  { %979 = vmatprep.subr.bf16.mxu0 %v1106_v49 }
  0x35   :  { %1022 = vmatpush3.bf16.msra.mxu1 %v1117_v62 }
  0x36   :  { %1023 = vmatprep.subr.bf16.mxu1 %v1131_v41 }
  0x37   :  { %980 = vmatpush3.bf16.msra.mxu0 %v1107_v54 }
  0x38   :  { %981 = vmatprep.subr.bf16.mxu0 %v1108_v55 }
  0x39   :  { %1024 = vmatpush3.bf16.msra.mxu1 %v1118_v63 }
  0x3a   :  { %1025 = vmatprep.subr.bf16.mxu1 %v1131_v41 }
  0x3b   :  { %982 = vmatpush3.bf16.msra.mxu0 %v1109_v56 }
  0x3c   :  { %983 = vmatprep.subr.bf16.mxu0 %v1110_v57 }
  0x3d   :  { %1026 = vmatpush3.bf16.msra.mxu1 %v1119_v0 }
  0x3e   :  { %1027 = vmatprep.subr.bf16.mxu1 %v1131_v41 }
  0x3f   :  { %984 = vmatpush3.bf16.msra.mxu0 %v1111_v58 }
  0x40   :  { %1037 = vmatprep.subr.bf16.mxu0 %v1131_v41 }
  0x41   :  { %1028 = vmatpush3.bf16.msra.mxu1 %v1120_v1 }
  0x42   :  { %571 = vmatmul.mubr.bf16.vlgmr.msra.gmra.mrb[4].mxu0 %v854_v59  ;;  %1029 = vmatprep.subr.bf16.mxu1 %v1131_v41 }
  0x43   :  { %1053 = vmatprep.mubr.msk.bf16.mxu0 %vm1132_vm0, %v1131_v41  ;;  %1038 = vmatpush3.bf16.msra.mxu0 %v1123_v4 }
  0x44   :  { %1039 = vmatprep.subr.bf16.mxu0 %v1131_v41 }
  0x45   :  { %1030 = vmatpush3.bf16.msra.mxu1 %v1121_v2 }
  0x46   :  { %1031 = vmatprep.subr.bf16.mxu1 %v1131_v41 }
  0x47   :  { %1040 = vmatpush3.bf16.msra.mxu0 %v1124_v5 }
  0x48   :  { %1041 = vmatprep.subr.bf16.mxu0 %v1131_v41 }
  0x49   :  { %1032 = vmatpush3.bf16.msra.mxu1 %v1122_v3 }
  0x4b   :  { %1042 = vmatpush3.bf16.msra.mxu0 %v1125_v6 }
  0x4c   :  { %1043 = vmatprep.subr.bf16.mxu0 %v1131_v41 }
  0x4f   :  { %1044 = vmatpush3.bf16.msra.mxu0 %v1126_v7 }
  0x50   :  { %1045 = vmatprep.subr.bf16.mxu0 %v1131_v41 }
  0x53   :  { %1046 = vmatpush3.bf16.msra.mxu0 %v1127_v8 }
  0x54   :  { %1047 = vmatprep.subr.bf16.mxu0 %v1131_v41 }
  0x57   :  { %1048 = vmatpush3.bf16.msra.mxu0 %v1128_v9 }
  0x58   :  { %1049 = vmatprep.subr.bf16.mxu0 %v1131_v41 }
  0x5b   :  { %1050 = vmatpush3.bf16.msra.mxu0 %v1129_v36 }
  0x5c   :  { %1051 = vmatprep.subr.bf16.mxu0 %v1131_v41  ;;  %v916_v41 = vld [vmem:[%s1421_s6] ss:$0 sm:$0xff] }
  0x5f   :  { %1052 = vmatpush3.bf16.msra.mxu0 %v1130_v37 }
  0xf5   :  { %v941_v10 = vpop.f32.mrb[0].mxu0 }
  0xf6   :  { %v942_v12 = vpop.f32.mrb[1].mxu0 }
  0xf7   :  { %v943_v13 = vadd.f32 %v942_v12, %v941_v10  ;;  %v944_v14 = vpop.f32.mrb[2].mxu0  ;;  %v963_v15 = vpop.f32.mrb[0].mxu1 }
  0xf8   :  { %v945_v16 = vpop.f32.mrb[3].mxu0  ;;  %v964_v18 = vpop.f32.mrb[1].mxu1 }
  0xf9   :  { %v493_v17 = vadd.f32 %v943_v13, %v849_v11  ;;  %v965_v19 = vadd.f32 %v964_v18, %v963_v15  ;;  %v966_v20 = vpop.f32.mrb[2].mxu1 }
  0xfa   :  { %v967_v21 = vpop.f32.mrb[3].mxu1 }
  0xfb   :  { %v533_v22 = vadd.f32 %v965_v19, %v493_v17 }
  0xff   :  { %v612_v23 = vpop.f32.mrb[4].mxu1 }
 0x100   :  { %v1015_v24 = vpop.f32.mrb[5].mxu1 }
 0x101   :  { %v615_v25 = vpop.f32.mrb[6].mxu1 }
 0x102   :  { %v1016_v26 = vpop.f32.mrb[7].mxu1 }
 0x115   :  { %v985_v27 = vpop.f32.mrb[4].mxu0 }
 0x116   :  { %v986_v28 = vpop.f32.mrb[5].mxu0 }
 0x117   :  { %v987_v29 = vadd.f32 %v986_v28, %v985_v27  ;;  %v988_v30 = vpop.f32.mrb[6].mxu0 }
 0x118   :  { %v989_v31 = vpop.f32.mrb[7].mxu0 }
 0x119   :  { %v573_v32 = vadd.f32 %v987_v29, %v533_v22 }
 0x11b   :  { %v613_v33 = vadd.f32 %v612_v23, %v573_v32 }
 0x11d   :  { %v618_v34 = vmax.f32 %v613_v33, 0.0 }
 0x11f   :  { %v619_v35 = vpack.c.bf16 %v618_v34, %v618_v34 }
 0x121   :  { %1034 = vmatmul.mubr.bf16.vlgmr.msra.gmra.mrb[8].mxu1 %v619_v35 }
 0x1f4   :  { %v725_v39 = vpop.f32.mrb[8].mxu1 }
 0x1f5   :  { %v726_v40 = vadd.f32 %v907_v38, %v725_v39  ;;  %v1035_v42 = vpop.f32.mrb[9].mxu1 }
 0x1f6   :  { %v728_v43 = vpop.f32.mrb[10].mxu1 }
 0x1f7   :  { %v731_v44 = vmax.f32 %v726_v40, 0.0  ;;  %v1036_v45 = vpop.f32.mrb[11].mxu1 }
 0x1f9   :  { %v732_v46 = vpack.c.bf16 %v731_v44, %v731_v44 }
 0x1fb   :  { %1054 = vmatmul.mubr.bf16.vlgmr.msra.gmra.mrb[8].mxu0 %v732_v46 }
 0x2ce   :  { %v838_v47 = vpop.f32.mrb[8].mxu0 }
 0x2cf   :  { %v839_v48 = vadd.f32 %v916_v41, %v838_v47  ;;  %v1055_v49 = vpop.f32.mrb[9].mxu0 }
 0x2d0   :  { %v841_v50 = vpop.f32.mrb[10].mxu0 }
 0x2d1   :  { %844 = vst [vmem:[%s1422_s7] sm:$0xff] %v839_v48  ;;  %v1056_v51 = vpop.f32.mrb[11].mxu0 }

</bundles_post_ra>
